<compile_context>
chip_gen: v7x
topology: tpu7x:2x2x1
jax: 0.10.0
libtpu: 0.0.40
codegen_flags: <defaults>
</compile_context>

<pallas_src>
import jax
import jax.numpy as jnp
from jax.experimental import pallas as pl
from jax.experimental.pallas import tpu as pltpu


def planar_flow_kernel(scal_ref, z_ref, u_ref, w_ref, z_out_ref, logdet_ref):
    wu = scal_ref[0]        # scalar: w . u   (precomputed in the wrapper)
    b = scal_ref[1]         # scalar bias
    z = z_ref[...]          # (T, D) f32
    u = u_ref[...]          # (1, D)
    w = w_ref[...]          # (1, D)  (the torch [D, 1] weight stored as a row)

    # linear = z @ w + b  -> VPU multiply + lane reduction (an N=1 matmul
    # would waste the MXU).
    linear_col = jnp.sum(z * w, axis=-1, keepdims=True) + b        # (T, 1)

    # Move the per-row scalars to a lane-dense (1, T) row so tanh / abs / log
    # run on full vregs and the log-det store is an unmasked, lane-dense vst.
    linear_row = jnp.transpose(linear_col)                          # (1, T)
    act_row = jnp.tanh(linear_row)                                  # (1, T)
    det_row = jnp.abs(1.0 + (1.0 - act_row * act_row) * wu)         # (1, T)
    logdet_ref[...] = jnp.log(det_row + 1e-6)                       # (1, T)

    # z_new = z + u * act   (broadcast act over the feature/lane axis)
    act_col = jnp.transpose(act_row)                                # (T, 1)
    z_out_ref[...] = z + u * act_col                                # (T, D)


def _pick_batch_tile(B):
    # Small problems: a single block (grid=(1,)) — wall clock is dominated by
    # launch + DMA latency, extra grid steps only add overhead.
    if B < 1024:
        return B
    # Large problems: largest tile that (a) divides B and (b) leaves an even
    # number (>= 2) of grid steps so both v7x TensorCores get work.
    for cand in (8192, 4096, 2048, 1024, 512):
        n = B // cand
        if B % cand == 0 and n >= 2 and n % 2 == 0:
            return cand
    half = B // 2
    if B % 2 == 0 and half % 128 == 0:
        return half
    return B


def planar_flow_forward(z, u, w, b, *, batch_tile=None):
    """z: [B, D] f32; u: [D]; w: [D, 1]; b: [1].
    Returns (z_new [B, D], log_det_jacobian [B])."""
    B, D = z.shape
    if batch_tile is None:
        batch_tile = _pick_batch_tile(B)
    assert B % batch_tile == 0, "batch must divide the batch tile"
    assert batch_tile % 8 == 0, "keep f32 sublane alignment"
    if batch_tile != B:
        assert batch_tile % 128 == 0, "multi-step grids need lane-aligned tiles"

    z = z.astype(jnp.float32)
    u2 = u.reshape(1, D).astype(jnp.float32)
    w2 = w.reshape(1, D).astype(jnp.float32)   # squeeze the [D, 1] weight to a row
    # Hoist the grid-invariant scalars (w . u and b) into SMEM.
    scal = jnp.concatenate(
        [jnp.sum(w2 * u2).reshape(1), b.reshape(1).astype(jnp.float32)])

    grid = (B // batch_tile,)

    z_new, logdet = pl.pallas_call(
        planar_flow_kernel,
        out_shape=[
            jax.ShapeDtypeStruct((B, D), jnp.float32),
            jax.ShapeDtypeStruct((1, B), jnp.float32),     # lane-dense log-det
        ],
        grid_spec=pltpu.PrefetchScalarGridSpec(
            num_scalar_prefetch=0,
            grid=grid,
            in_specs=[
                pl.BlockSpec(memory_space=pltpu.MemorySpace.SMEM),  # [w.u, b]
                pl.BlockSpec((batch_tile, D), lambda i: (i, 0)),    # z
                pl.BlockSpec((1, D), lambda i: (0, 0)),             # u (invariant)
                pl.BlockSpec((1, D), lambda i: (0, 0)),             # w (invariant)
            ],
            out_specs=[
                pl.BlockSpec((batch_tile, D), lambda i: (i, 0)),    # z_new
                pl.BlockSpec((1, batch_tile), lambda i: (0, i)),    # log_det row
            ],
        ),
        compiler_params=pltpu.CompilerParams(
            dimension_semantics=("parallel",)),
    )(scal, z, u2, w2)

    return z_new, logdet.reshape(B)


def planar_flow_reference(z, u, w, b):
    """Pure-JAX reference mirroring the PyTorch FlowLayer.forward."""
    linear = z @ w + b                                # (B, 1)
    activation = jnp.tanh(linear)                     # (B, 1)
    z_new = z + u[None, :] * activation               # (B, D)
    psi = (1.0 - activation ** 2) * w[:, 0]           # (B, D)
    det = jnp.abs(1.0 + psi @ u)                      # (B,)
    log_det = jnp.log(det + 1e-6)
    return z_new, log_det


if __name__ == "__main__":
    # Shapes consistent with the module: latent_dim = 50.
    latent_dim = 50

    key = jax.random.PRNGKey(0)
    ku, kw = jax.random.split(key, 2)
    u = jax.random.normal(ku, (latent_dim,), jnp.float32)
    w = jax.random.normal(kw, (latent_dim, 1), jnp.float32)
    b = jnp.zeros((1,), jnp.float32)

    # Two small configs: single-block path (grid=(1,)) and a 2-step parallel
    # grid to exercise the tiled / lane-dense log-det path.
    for batch, tile in ((256, None), (1024, 512)):
        kz = jax.random.fold_in(key, batch)
        z = jax.random.normal(kz, (batch, latent_dim), jnp.float32)

        z_new, logdet = planar_flow_forward(z, u, w, b, batch_tile=tile)
        z_new = jax.block_until_ready(z_new)
        logdet = jax.block_until_ready(logdet)

        ref_z, ref_logdet = planar_flow_reference(z, u, w, b)
        assert z_new.shape == (batch, latent_dim)
        assert logdet.shape == (batch,)
        assert jnp.allclose(z_new, ref_z, atol=1e-4, rtol=1e-4)
        assert jnp.allclose(logdet, ref_logdet, atol=1e-4, rtol=1e-4)

    print("KERNEL_OK")
</pallas_src>

<mosaic_0001>
module attributes {stable_mosaic.version = 11 : i64} {
  func.func @planar_flow_kernel(%arg0: i32, %arg1: memref<2xf32, #tpu.memory_space<smem>>, %arg2: memref<256x50xf32, #tpu.memory_space<vmem>>, %arg3: memref<1x50xf32, #tpu.memory_space<vmem>>, %arg4: memref<1x50xf32, #tpu.memory_space<vmem>>, %arg5: memref<256x50xf32, #tpu.memory_space<vmem>>, %arg6: memref<1x256xf32, #tpu.memory_space<vmem>>) attributes {dimension_semantics = [#tpu.dimension_semantics<parallel>], iteration_bounds = array<i64: 1>, scalar_prefetch = 0 : i64, scratch_operands = 0 : i64, tpu.core_type = #tpu.core_type<tc>, window_params = [{transform_indices = @transform_0, window_bounds = array<i64: 2>}, {transform_indices = @transform_1, window_bounds = array<i64: 256, 50>}, {pipeline_mode = #tpu.pipeline_mode<synchronous>, transform_indices = @transform_2, window_bounds = array<i64: 1, 50>}, {pipeline_mode = #tpu.pipeline_mode<synchronous>, transform_indices = @transform_3, window_bounds = array<i64: 1, 50>}, {transform_indices = @transform_4, window_bounds = array<i64: 256, 50>}, {transform_indices = @transform_5, window_bounds = array<i64: 1, 256>}]} {
    %c0 = arith.constant 0 : index
    %0 = memref.load %arg1[%c0] : memref<2xf32, #tpu.memory_space<smem>>
    %c1 = arith.constant 1 : index
    %1 = memref.load %arg1[%c1] : memref<2xf32, #tpu.memory_space<smem>>
    %c0_0 = arith.constant 0 : index
    %c0_1 = arith.constant 0 : index
    %2 = vector.load %arg2[%c0_0, %c0_1] : memref<256x50xf32, #tpu.memory_space<vmem>>, vector<256x50xf32>
    %c0_2 = arith.constant 0 : index
    %c0_3 = arith.constant 0 : index
    %3 = vector.load %arg3[%c0_2, %c0_3] : memref<1x50xf32, #tpu.memory_space<vmem>>, vector<1x50xf32>
    %c0_4 = arith.constant 0 : index
    %c0_5 = arith.constant 0 : index
    %4 = vector.load %arg4[%c0_4, %c0_5] : memref<1x50xf32, #tpu.memory_space<vmem>>, vector<1x50xf32>
    %5 = vector.broadcast %4 : vector<1x50xf32> to vector<256x50xf32>
    %6 = arith.mulf %2, %5 : vector<256x50xf32>
    %cst = arith.constant dense<0.000000e+00> : vector<256xf32>
    %7 = vector.multi_reduction <add>, %6, %cst [1] : vector<256x50xf32> to vector<256xf32>
    %8 = vector.shape_cast %7 : vector<256xf32> to vector<256x1xf32>
    %9 = vector.broadcast %1 : f32 to vector<256x1xf32>
    %10 = arith.addf %8, %9 : vector<256x1xf32>
    %11 = tpu.transpose %10, [1, 0] : vector<256x1xf32> -> vector<1x256xf32>
    %12 = math.tanh %11 : vector<1x256xf32>
    %13 = arith.mulf %12, %12 : vector<1x256xf32>
    %cst_6 = arith.constant 1.000000e+00 : f32
    %14 = vector.broadcast %cst_6 : f32 to vector<1x256xf32>
    %15 = arith.subf %14, %13 : vector<1x256xf32>
    %16 = vector.broadcast %0 : f32 to vector<1x256xf32>
    %17 = arith.mulf %15, %16 : vector<1x256xf32>
    %cst_7 = arith.constant 1.000000e+00 : f32
    %18 = vector.broadcast %cst_7 : f32 to vector<1x256xf32>
    %19 = arith.addf %18, %17 : vector<1x256xf32>
    %20 = math.absf %19 : vector<1x256xf32>
    %cst_8 = arith.constant 9.99999997E-7 : f32
    %21 = vector.broadcast %cst_8 : f32 to vector<1x256xf32>
    %22 = arith.addf %20, %21 : vector<1x256xf32>
    %23 = math.log %22 : vector<1x256xf32>
    %c0_9 = arith.constant 0 : index
    %c0_10 = arith.constant 0 : index
    %24 = vector.load %arg6[%c0_9, %c0_10] : memref<1x256xf32, #tpu.memory_space<vmem>>, vector<1x256xf32>
    tpu.vector_store %arg6[%c0_9, %c0_10], %23 {strides = array<i32>} : memref<1x256xf32, #tpu.memory_space<vmem>>, vector<1x256xf32>,
    %25 = tpu.transpose %12, [1, 0] : vector<1x256xf32> -> vector<256x1xf32>
    %26 = vector.broadcast %3 : vector<1x50xf32> to vector<256x50xf32>
    %27 = vector.broadcast %25 : vector<256x1xf32> to vector<256x50xf32>
    %28 = arith.mulf %26, %27 : vector<256x50xf32>
    %29 = arith.addf %2, %28 : vector<256x50xf32>
    %c0_11 = arith.constant 0 : index
    %c0_12 = arith.constant 0 : index
    %30 = vector.load %arg5[%c0_11, %c0_12] : memref<256x50xf32, #tpu.memory_space<vmem>>, vector<256x50xf32>
    tpu.vector_store %arg5[%c0_11, %c0_12], %29 {strides = array<i32>} : memref<256x50xf32, #tpu.memory_space<vmem>>, vector<256x50xf32>,
    return
  }
  func.func @transform_0(%arg0: i32) -> i32 {
    %c0_i32 = arith.constant 0 : i32
    %c0_i32_0 = arith.constant 0 : i32
    return %c0_i32 : i32
  }
  func.func @transform_1(%arg0: i32) -> (i32, i32) {
    %c0_i32 = arith.constant 0 : i32
    %c0_i32_0 = arith.constant 0 : i32
    return %arg0, %c0_i32 : i32, i32
  }
  func.func @transform_2(%arg0: i32) -> (i32, i32) {
    %c0_i32 = arith.constant 0 : i32
    %c0_i32_0 = arith.constant 0 : i32
    %c0_i32_1 = arith.constant 0 : i32
    return %c0_i32, %c0_i32_0 : i32, i32
  }
  func.func @transform_3(%arg0: i32) -> (i32, i32) {
    %c0_i32 = arith.constant 0 : i32
    %c0_i32_0 = arith.constant 0 : i32
    %c0_i32_1 = arith.constant 0 : i32
    return %c0_i32, %c0_i32_0 : i32, i32
  }
  func.func @transform_4(%arg0: i32) -> (i32, i32) {
    %c0_i32 = arith.constant 0 : i32
    %c0_i32_0 = arith.constant 0 : i32
    return %arg0, %c0_i32 : i32, i32
  }
  func.func @transform_5(%arg0: i32) -> (i32, i32) {
    %c0_i32 = arith.constant 0 : i32
    %c0_i32_0 = arith.constant 0 : i32
    return %c0_i32, %arg0 : i32, i32
  }
}

</mosaic_0001>

<bundles_post_ra>
// kernel: tpu_custom_call.1
= control target key start
LH: loop header
LB: loop body
LE: loop exit
PB: predicated region body
PF: predicated region fallthrough
CT: control target
= control target key end

     0   :  { %11 = vsyncpa [#allocation4], 0  ;;  %s1285_s0 = inlined_call_operand.vmem [shape: f32[2], index: 0, kind: input, shape index: {}]   ;;  %s1286_s1 = inlined_call_operand.vmem [shape: f32[256,50], index: 1, kind: input, shape index: {}]   ;;  %s1287_s2 = inlined_call_operand.vmem [shape: f32[1,50], index: 2, kind: input, shape index: {}]   ;;  %s1288_s3 = inlined_call_operand.vmem [shape: f32[1,50], index: 3, kind: input, shape index: {}]   ;;  %s1289_s4 = inlined_call_operand.vmem [shape: f32[256,50], index: 4, kind: output, shape index: {0}]   ;;  %s1290_s5 = inlined_call_operand.hbm [shape: f32[1,256], index: 5, kind: output, shape index: {1}]  }
   0x1   :  { %12 = vsyncpa [#allocation3], 0  ;;  %s19_s20 = sshll.u32 %s1285_s0, 4  ;;  %s20_s20 = int_to_ptr.vmem [resolvable:$true] %s19_s20 }
   0x2   :  { %s706_s21 = scalar_lea.vmem %s20_s20, 16  ;;  %p711_p1 = scmp.lt.s32.totalorder %s20_s20, %s20_s20 }
   0x3   :  { %p707_p0 = scmp.ne.s32.totalorder %s20_s20, %s706_s21  ;;  %p712_p2 = scmp.lt.s32.totalorder %s706_s21, %s706_s21 }
   0x5   :  { %p713_p3 = por %p712_p2, %p711_p1 }
   0x7   :  { %p714_p4 = pnand %p713_p3, %p707_p0 }
   0x9   :  { %717 = shalt.err (!%p714_p4)
}
   0xa   :  { %s744_s22 = smov [#allocation2]  }
   0xb   :  { %22 = dma.vmem_to_smem %s20_s20, 16, %s744_s22, [#allocation4]  }
   0xc   :  { %740 = dma.done.wait [#allocation4], 16  }
   0xd   :  { %741 = vsyncadd [#allocation4], 4294967280 }
   0xe   :  { %32 = sfence }
   0xf   :  { %v784_v0 = vld [vmem:[%s1286_s1] sm:$0xff]  ;;  %vm107_vm0 = vcmask 408576   ;;  %v794_v2 = vld [vmem:[%s1286_s1 + $0x10] sm:$0xff]  ;;  %v803_v5 = vld [vmem:[%s1286_s1 + $0x8] sm:$0xff]  ;;  %s33_s8 = sld [smem:[#allocation2]]  ;;  %s747_s20 = smov [#allocation5]  }
  0x10   :  { %v789_v1 = vld [vmem:[%s1288_s3] ss:$0 sm:$0xff]  ;;  %v808_v6 = vld [vmem:[%s1286_s1 + $0x18] sm:$0xff]  ;;  %v822_v10 = vld [vmem:[%s1286_s1 + $0x28] sm:$0xff]  ;;  %s677_s21 = sshll.u32 %s747_s20, 4  ;;  %s678_s21 = int_to_ptr.vmem [resolvable:$true] %s677_s21 }
  0x11   :  { %v75_v3 = vmul.f32 %v789_v1, %v784_v0  ;;  %v77_v4 = vmul.f32 %v789_v1, %v794_v2  ;;  %v76_v7 = vmul.f32 %v789_v1, %v803_v5  ;;  %v78_v8 = vmul.f32 %v789_v1, %v808_v6  ;;  %v817_v9 = vld [vmem:[%s1286_s1 + $0x20] sm:$0xff]  ;;  %v835_v17 = vld [vmem:[%s1286_s1 + $0x30] sm:$0xff]  ;;  %v840_v18 = vld [vmem:[%s1286_s1 + $0x38] sm:$0xff]  ;;  %s718_s24 = scalar_lea.vmem %s678_s21, 32  ;;  %p723_p6 = scmp.lt.s32.totalorder %s678_s21, %s678_s21 }
  0x12   :  { %v79_v15 = vmul.f32 %v789_v1, %v817_v9  ;;  %v80_v16 = vmul.f32 %v789_v1, %v822_v10  ;;  %v81_v21 = vmul.f32 %v789_v1, %v835_v17  ;;  %v82_v22 = vmul.f32 %v789_v1, %v840_v18  ;;  %v851_v23 = vld [vmem:[%s1286_s1 + $0x40] sm:$0xff]  ;;  %v856_v24 = vld [vmem:[%s1286_s1 + $0x48] sm:$0xff]  ;;  %v867_v29 = vld [vmem:[%s1286_s1 + $0x50] sm:$0xff]  ;;  %p719_p5 = scmp.ne.s32.totalorder %s678_s21, %s718_s24  ;;  %p724_p7 = scmp.lt.s32.totalorder %s718_s24, %s718_s24 }
  0x13   :  { %v108_v11 = vsel %vm107_vm0, %v75_v3, 0.0  ;;  %v114_v12 = vsel %vm107_vm0, %v77_v4, 0.0  ;;  %v111_v13 = vsel %vm107_vm0, %v76_v7, 0.0  ;;  %v117_v14 = vsel %vm107_vm0, %v78_v8, 0.0  ;;  %v872_v30 = vld [vmem:[%s1286_s1 + $0x58] sm:$0xff]  ;;  %v883_v35 = vld [vmem:[%s1286_s1 + $0x60] sm:$0xff] }
  0x14   :  { %109 = vadd.xlane.f32.xlu0 %v108_v11  ;;  %115 = vadd.xlane.f32.xlu1 %v114_v12  ;;  %v120_v19 = vsel %vm107_vm0, %v79_v15, 0.0  ;;  %v123_v20 = vsel %vm107_vm0, %v80_v16, 0.0  ;;  %v126_v25 = vsel %vm107_vm0, %v81_v21, 0.0  ;;  %v129_v26 = vsel %vm107_vm0, %v82_v22, 0.0  ;;  %v888_v36 = vld [vmem:[%s1286_s1 + $0x68] sm:$0xff]  ;;  %v899_v41 = vld [vmem:[%s1286_s1 + $0x70] sm:$0xff]  ;;  %p725_p8 = por %p724_p7, %p723_p6 }
  0x15   :  { %v83_v27 = vmul.f32 %v789_v1, %v851_v23  ;;  %v84_v28 = vmul.f32 %v789_v1, %v856_v24  ;;  %v85_v33 = vmul.f32 %v789_v1, %v867_v29  ;;  %v86_v34 = vmul.f32 %v789_v1, %v872_v30  ;;  %v904_v42 = vld [vmem:[%s1286_s1 + $0x78] sm:$0xff]  ;;  %v915_v47 = vld [vmem:[%s1286_s1 + $0x80] sm:$0xff]  ;;  %v920_v48 = vld [vmem:[%s1286_s1 + $0x88] sm:$0xff] }
  0x16   :  { %v87_v39 = vmul.f32 %v789_v1, %v883_v35  ;;  %v88_v40 = vmul.f32 %v789_v1, %v888_v36  ;;  %v89_v45 = vmul.f32 %v789_v1, %v899_v41  ;;  %v90_v46 = vmul.f32 %v789_v1, %v904_v42  ;;  %v931_v53 = vld [vmem:[%s1286_s1 + $0x90] sm:$0xff]  ;;  %v936_v54 = vld [vmem:[%s1286_s1 + $0x98] sm:$0xff]  ;;  %v947_v59 = vld [vmem:[%s1286_s1 + $0xa0] sm:$0xff]  ;;  %p726_p9 = pnand %p725_p8, %p719_p5 }
  0x17   :  { %v132_v31 = vsel %vm107_vm0, %v83_v27, 0.0  ;;  %v135_v32 = vsel %vm107_vm0, %v84_v28, 0.0  ;;  %v138_v37 = vsel %vm107_vm0, %v85_v33, 0.0  ;;  %v141_v38 = vsel %vm107_vm0, %v86_v34, 0.0  ;;  %v952_v60 = vld [vmem:[%s1286_s1 + $0xa8] sm:$0xff]  ;;  %v963_v4 = vld [vmem:[%s1286_s1 + $0xb0] sm:$0xff] }
  0x18   :  { %112 = vadd.xlane.f32.xlu0 %v111_v13  ;;  %118 = vadd.xlane.f32.xlu1 %v117_v14  ;;  %v144_v43 = vsel %vm107_vm0, %v87_v39, 0.0  ;;  %v147_v44 = vsel %vm107_vm0, %v88_v40, 0.0  ;;  %v150_v49 = vsel %vm107_vm0, %v89_v45, 0.0  ;;  %v153_v50 = vsel %vm107_vm0, %v90_v46, 0.0  ;;  %v968_v7 = vld [vmem:[%s1286_s1 + $0xb8] sm:$0xff]  ;;  %v979_v14 = vld [vmem:[%s1286_s1 + $0xc0] sm:$0xff] }
  0x19   :  { %v91_v51 = vmul.f32 %v789_v1, %v915_v47  ;;  %v92_v52 = vmul.f32 %v789_v1, %v920_v48  ;;  %v93_v57 = vmul.f32 %v789_v1, %v931_v53  ;;  %v94_v58 = vmul.f32 %v789_v1, %v936_v54  ;;  %v984_v15 = vld [vmem:[%s1286_s1 + $0xc8] sm:$0xff]  ;;  %v995_v22 = vld [vmem:[%s1286_s1 + $0xd0] sm:$0xff] }
  0x1a   :  { %v95_v63 = vmul.f32 %v789_v1, %v947_v59  ;;  %v96_v3 = vmul.f32 %v789_v1, %v952_v60  ;;  %v97_v12 = vmul.f32 %v789_v1, %v963_v4  ;;  %v98_v13 = vmul.f32 %v789_v1, %v968_v7  ;;  %v1016_v33 = vld [vmem:[%s1286_s1 + $0xe8] sm:$0xff]  ;;  %v1027_v40 = vld [vmem:[%s1286_s1 + $0xf0] sm:$0xff] }
  0x1b   :  { %v156_v55 = vsel %vm107_vm0, %v91_v51, 0.0  ;;  %v159_v56 = vsel %vm107_vm0, %v92_v52, 0.0  ;;  %v162_v61 = vsel %vm107_vm0, %v93_v57, 0.0  ;;  %v165_v62 = vsel %vm107_vm0, %v94_v58, 0.0 }
  0x1c   :  { %121 = vadd.xlane.f32.xlu0 %v120_v19  ;;  %124 = vadd.xlane.f32.xlu1 %v123_v20  ;;  %v168_v8 = vsel %vm107_vm0, %v95_v63, 0.0  ;;  %v171_v11 = vsel %vm107_vm0, %v96_v3, 0.0  ;;  %v174_v16 = vsel %vm107_vm0, %v97_v12, 0.0  ;;  %v177_v19 = vsel %vm107_vm0, %v98_v13, 0.0 }
  0x1d   :  { %v99_v20 = vmul.f32 %v789_v1, %v979_v14  ;;  %v100_v21 = vmul.f32 %v789_v1, %v984_v15  ;;  %v101_v28 = vmul.f32 %v789_v1, %v995_v22  ;;  %v104_v39 = vmul.f32 %v789_v1, %v1016_v33 }
  0x1e   :  { %v105_v46 = vmul.f32 %v789_v1, %v1027_v40 }
  0x1f   :  { %v183_v27 = vsel %vm107_vm0, %v100_v21, 0.0  ;;  %v186_v34 = vsel %vm107_vm0, %v101_v28, 0.0  ;;  %v195_v45 = vsel %vm107_vm0, %v104_v39, 0.0 }
  0x20   :  { %127 = vadd.xlane.f32.xlu0 %v126_v25  ;;  %130 = vadd.xlane.f32.xlu1 %v129_v26  ;;  %v1000_v25 = vld [vmem:[%s1286_s1 + $0xd8] sm:$0xff]  ;;  %v180_v26 = vsel %vm107_vm0, %v99_v20, 0.0 }
  0x24   :  { %133 = vadd.xlane.f32.xlu0 %v132_v31  ;;  %136 = vadd.xlane.f32.xlu1 %v135_v32  ;;  %v102_v31 = vmul.f32 %v789_v1, %v1000_v25  ;;  %v1011_v32 = vld [vmem:[%s1286_s1 + $0xe0] sm:$0xff] }
  0x28   :  { %139 = vadd.xlane.f32.xlu0 %v138_v37  ;;  %142 = vadd.xlane.f32.xlu1 %v141_v38  ;;  %v189_v37 = vsel %vm107_vm0, %v102_v31, 0.0  ;;  %v103_v38 = vmul.f32 %v789_v1, %v1011_v32 }
  0x2c   :  { %145 = vadd.xlane.f32.xlu0 %v144_v43  ;;  %148 = vadd.xlane.f32.xlu1 %v147_v44  ;;  %v1032_v43 = vld [vmem:[%s1286_s1 + $0xf8] sm:$0xff]  ;;  %v192_v44 = vsel %vm107_vm0, %v103_v38, 0.0  ;;  %s688_s1 = sld [smem:[#allocation2 + $0x1]] }
  0x30   :  { %151 = vadd.xlane.f32.xlu0 %v150_v49  ;;  %154 = vadd.xlane.f32.xlu1 %v153_v50  ;;  %v106_v49 = vmul.f32 %v789_v1, %v1032_v43  ;;  %v198_v50 = vsel %vm107_vm0, %v105_v46, 0.0 }
  0x32   :  { %v201_v51 = vsel %vm107_vm0, %v106_v49, 0.0  ;;  %v1042_v52 = vstv %s688_s1 }
  0x34   :  { %157 = vadd.xlane.f32.xlu0 %v156_v55  ;;  %160 = vadd.xlane.f32.xlu1 %v159_v56 }
  0x38   :  { %163 = vadd.xlane.f32.xlu0 %v162_v61  ;;  %166 = vadd.xlane.f32.xlu1 %v165_v62 }
  0x3c   :  { %169 = vadd.xlane.f32.xlu0 %v168_v8  ;;  %172 = vadd.xlane.f32.xlu1 %v171_v11 }
  0x40   :  { %175 = vadd.xlane.f32.xlu0 %v174_v16  ;;  %178 = vadd.xlane.f32.xlu1 %v177_v19 }
  0x44   :  { %181 = vadd.xlane.f32.xlu0 %v180_v26  ;;  %184 = vadd.xlane.f32.xlu1 %v183_v27 }
  0x48   :  { %187 = vadd.xlane.f32.xlu0 %v186_v34  ;;  %190 = vadd.xlane.f32.xlu1 %v189_v37 }
  0x4c   :  { %193 = vadd.xlane.f32.xlu0 %v192_v44  ;;  %196 = vadd.xlane.f32.xlu1 %v195_v45 }
  0x50   :  { %199 = vadd.xlane.f32.xlu0 %v198_v50  ;;  %202 = vadd.xlane.f32.xlu1 %v201_v51 }
  0xa1   :  { %v110_v55 = vpop.xlane.xlu0 %109  ;;  %v116_v56 = vpop.xlane.xlu1 %115 }
  0xa2   :  { %v205_v57 = vadd.f32 %v1042_v52, %v110_v55  ;;  %v207_v62 = vadd.f32 %v1042_v52, %v116_v56 }
  0xa4   :  { %237 = vxpose.xlu0.b32.start [1/16] (narrow) %v205_v57, 8 }
  0xa5   :  { %v113_v58 = vpop.xlane.xlu0 %112  ;;  %v119_v61 = vpop.xlane.xlu1 %118 }
  0xa6   :  { %v206_v1 = vadd.f32 %v1042_v52, %v113_v58  ;;  %v208_v8 = vadd.f32 %v1042_v52, %v119_v61 }
  0xa8   :  { %238 = vxpose.xlu0.b32.cont [2/16] (narrow) %v206_v1, 8 }
  0xa9   :  { %v122_v63 = vpop.xlane.xlu0 %121  ;;  %v125_v3 = vpop.xlane.xlu1 %124 }
  0xaa   :  { %v209_v13 = vadd.f32 %v1042_v52, %v122_v63  ;;  %v210_v20 = vadd.f32 %v1042_v52, %v125_v3 }
  0xac   :  { %239 = vxpose.xlu0.b32.cont [3/16] (narrow) %v207_v62, 8 }
  0xad   :  { %v128_v11 = vpop.xlane.xlu0 %127  ;;  %v131_v12 = vpop.xlane.xlu1 %130 }
  0xae   :  { %v211_v27 = vadd.f32 %v1042_v52, %v128_v11  ;;  %v212_v34 = vadd.f32 %v1042_v52, %v131_v12 }
  0xb0   :  { %240 = vxpose.xlu0.b32.cont [4/16] (narrow) %v208_v8, 8 }
  0xb1   :  { %v134_v16 = vpop.xlane.xlu0 %133  ;;  %v137_v19 = vpop.xlane.xlu1 %136 }
  0xb2   :  { %v213_v39 = vadd.f32 %v1042_v52, %v134_v16  ;;  %v214_v49 = vadd.f32 %v1042_v52, %v137_v19 }
  0xb4   :  { %241 = vxpose.xlu0.b32.cont [5/16] (narrow) %v209_v13, 8 }
  0xb5   :  { %v140_v21 = vpop.xlane.xlu0 %139  ;;  %v143_v26 = vpop.xlane.xlu1 %142 }
  0xb6   :  { %v215_v55 = vadd.f32 %v1042_v52, %v140_v21  ;;  %v216_v58 = vadd.f32 %v1042_v52, %v143_v26 }
  0xb8   :  { %242 = vxpose.xlu0.b32.cont [6/16] (narrow) %v210_v20, 8 }
  0xb9   :  { %v146_v28 = vpop.xlane.xlu0 %145  ;;  %v149_v31 = vpop.xlane.xlu1 %148 }
  0xba   :  { %v217_v62 = vadd.f32 %v1042_v52, %v146_v28  ;;  %v218_v8 = vadd.f32 %v1042_v52, %v149_v31 }
  0xbc   :  { %243 = vxpose.xlu0.b32.cont [7/16] (narrow) %v211_v27, 8 }
  0xbd   :  { %v152_v37 = vpop.xlane.xlu0 %151  ;;  %v155_v38 = vpop.xlane.xlu1 %154 }
  0xbe   :  { %v219_v13 = vadd.f32 %v1042_v52, %v152_v37  ;;  %v220_v20 = vadd.f32 %v1042_v52, %v155_v38 }
  0xc0   :  { %244 = vxpose.xlu0.b32.cont [8/16] (narrow) %v212_v34, 8 }
  0xc1   :  { %v158_v44 = vpop.xlane.xlu0 %157  ;;  %v161_v45 = vpop.xlane.xlu1 %160 }
  0xc2   :  { %v221_v46 = vadd.f32 %v1042_v52, %v158_v44  ;;  %v222_v50 = vadd.f32 %v1042_v52, %v161_v45 }
  0xc4   :  { %269 = vxpose.xlu1.b32.start [1/16] (narrow) %v221_v46, 8  ;;  %245 = vxpose.xlu0.b32.cont [9/16] (narrow) %v213_v39, 8 }
  0xc5   :  { %v164_v51 = vpop.xlane.xlu0 %163  ;;  %v167_v57 = vpop.xlane.xlu1 %166 }
  0xc6   :  { %v223_v56 = vadd.f32 %v1042_v52, %v164_v51  ;;  %v224_v61 = vadd.f32 %v1042_v52, %v167_v57  ;;  %v745_v57 = vmov 0  }
  0xc8   :  { %270 = vxpose.xlu1.b32.cont [2/16] (narrow) %v222_v50, 8  ;;  %246 = vxpose.xlu0.b32.cont [10/16] (narrow) %v214_v49, 8 }
  0xc9   :  { %v170_v1 = vpop.xlane.xlu0 %169  ;;  %v173_v3 = vpop.xlane.xlu1 %172 }
  0xca   :  { %v225_v63 = vadd.f32 %v1042_v52, %v170_v1  ;;  %v226_v11 = vadd.f32 %v1042_v52, %v173_v3  ;;  %v307_v3 = vstv %s33_s8 }
  0xcc   :  { %271 = vxpose.xlu1.b32.cont [3/16] (narrow) %v223_v56, 8  ;;  %247 = vxpose.xlu0.b32.cont [11/16] (narrow) %v215_v55, 8 }
  0xcd   :  { %v176_v12 = vpop.xlane.xlu0 %175  ;;  %v179_v19 = vpop.xlane.xlu1 %178 }
  0xce   :  { %v227_v16 = vadd.f32 %v1042_v52, %v176_v12  ;;  %v228_v21 = vadd.f32 %v1042_v52, %v179_v19 }
  0xd0   :  { %272 = vxpose.xlu1.b32.cont [4/16] (narrow) %v224_v61, 8  ;;  %248 = vxpose.xlu0.b32.cont [12/16] (narrow) %v216_v58, 8 }
  0xd1   :  { %v182_v26 = vpop.xlane.xlu0 %181  ;;  %v185_v28 = vpop.xlane.xlu1 %184 }
  0xd2   :  { %v229_v27 = vadd.f32 %v1042_v52, %v182_v26  ;;  %v230_v31 = vadd.f32 %v1042_v52, %v185_v28  ;;  %v746_v28 = vmov 1966171168  }
  0xd4   :  { %273 = vxpose.xlu1.b32.cont [5/16] (narrow) %v225_v63, 8  ;;  %249 = vxpose.xlu0.b32.cont [13/16] (narrow) %v217_v62, 8 }
  0xd5   :  { %v188_v34 = vpop.xlane.xlu0 %187  ;;  %v191_v39 = vpop.xlane.xlu1 %190 }
  0xd6   :  { %v231_v37 = vadd.f32 %v1042_v52, %v188_v34  ;;  %v232_v38 = vadd.f32 %v1042_v52, %v191_v39  ;;  %v326_v34 = vlaneseq }
  0xd8   :  { %274 = vxpose.xlu1.b32.cont [6/16] (narrow) %v226_v11, 8  ;;  %250 = vxpose.xlu0.b32.cont [14/16] (narrow) %v218_v8, 8  ;;  %v327_v39 = vshrl.u32 %v326_v34, 7  ;;  %vm340_vm1 = vcmp.lt.s32.totalorder %v326_v34, 256 }
  0xd9   :  { %v194_v44 = vpop.xlane.xlu0 %193  ;;  %v197_v46 = vpop.xlane.xlu1 %196 }
  0xda   :  { %v233_v45 = vadd.f32 %v1042_v52, %v194_v44  ;;  %v234_v49 = vadd.f32 %v1042_v52, %v197_v46 }
  0xdc   :  { %275 = vxpose.xlu1.b32.cont [7/16] (narrow) %v227_v16, 8  ;;  %251 = vxpose.xlu0.b32.cont [15/16] (narrow) %v219_v13, 8 }
  0xdd   :  { %v200_v50 = vpop.xlane.xlu0 %199  ;;  %v203_v55 = vpop.xlane.xlu1 %202 }
  0xde   :  { %v235_v51 = vadd.f32 %v1042_v52, %v200_v50  ;;  %v236_v56 = vadd.f32 %v1042_v52, %v203_v55 }
  0xe0   :  { %276 = vxpose.xlu1.b32.cont [8/16] (narrow) %v228_v21, 8  ;;  %252 = vxpose.xlu0.b32.end [16/16] (narrow) %v220_v20, 8 }
  0xe4   :  { %277 = vxpose.xlu1.b32.cont [9/16] (narrow) %v229_v27, 8 }
  0xe8   :  { %278 = vxpose.xlu1.b32.cont [10/16] (narrow) %v230_v31, 8  ;;  %v324_v31 = vunpack.c.l.s4 %v746_v28 }
  0xec   :  { %279 = vxpose.xlu1.b32.cont [11/16] (narrow) %v231_v37, 8  ;;  %v325_v37 = vunpack.c.0.s8 %v324_v31 }
  0xf0   :  { %280 = vxpose.xlu1.b32.cont [12/16] (narrow) %v232_v38, 8 }
  0xf4   :  { %281 = vxpose.xlu1.b32.cont [13/16] (narrow) %v233_v45, 8 }
  0xf8   :  { %282 = vxpose.xlu1.b32.cont [14/16] (narrow) %v234_v49, 8  ;;  %v328_v49 = vsub.s32 %v325_v37, %v327_v39 }
  0xfc   :  { %283 = vxpose.xlu1.b32.cont [15/16] (narrow) %v235_v51, 8 }
 0x100   :  { %284 = vxpose.xlu1.b32.end [16/16] (narrow) %v236_v56, 8 }
 0x11e   :  { %696 = vset.pattern.permute.xlu1 %v745_v57 }
 0x124   :  { %v253_v58 = vpop.trf.xlu0 }
 0x125   :  { %698 = vtanh.f32 %v253_v58 }
 0x12f   :  { %v699_v61 = vpop.eup %698 }
 0x130   :  { %343 = vxpose.xlu0.b32.start.end [1/1] (short) %v699_v61, 128  ;;  %v303_v1 = vmul.f32 %v699_v61, %v699_v61 }
 0x132   :  { %v305_v63 = vsub.f32 1.0, %v303_v1 }
 0x134   :  { %v308_v8 = vmul.f32 %v307_v3, %v305_v63 }
 0x136   :  { %v310_v11 = vadd.f32 1.0, %v308_v8 }
 0x138   :  { %v312_v19 = vand.u32 2147483647, %v310_v11 }
 0x13a   :  { %v314_v21 = vadd.f32 1e-06, %v312_v19 }
 0x144   :  { %v285_v62 = vpop.trf.xlu1 }
 0x145   :  { %700 = vtanh.f32 %v285_v62 }
 0x146   :  { %702 = vlog2.f32 %v314_v21 }
 0x14f   :  { %v701_v12 = vpop.eup %700 }
 0x150   :  { %v304_v13 = vmul.f32 %v701_v12, %v701_v12  ;;  %v703_v38 = vpop.eup %702 }
 0x151   :  { %v317_v45 = vmul.f32 0.6931472, %v703_v38 }
 0x152   :  { %v306_v16 = vsub.f32 1.0, %v304_v13 }
 0x154   :  { %v309_v52 = vmul.f32 %v307_v3, %v306_v16 }
 0x156   :  { %v311_v20 = vadd.f32 1.0, %v309_v52 }
 0x158   :  { %v313_v26 = vand.u32 2147483647, %v311_v20 }
 0x15a   :  { %v315_v27 = vadd.f32 1e-06, %v313_v26 }
 0x15c   :  { %704 = vlog2.f32 %v315_v27 }
 0x166   :  { %v705_v44 = vpop.eup %704 }
 0x167   :  { %v319_v46 = vmul.f32 0.6931472, %v705_v44 }
 0x169   :  { %v322_v50 = vcombine.low %v317_v45, %v319_v46 }
 0x16b   :  { %v329_v51 = vrot.slane %v322_v50, %v328_v49  ;;  %v1079_v50 = vld [vmem:[%s1287_s2] ss:$0 sm:$0xff] }
 0x16d   :  { %375 = vxpose.xlu0.b32.start.end [1/1] (short) %v701_v12, 128  ;;  %v336_v55 = vrot.slane %v329_v51, %v328_v49 }
 0x16f   :  { %342 = vst.msk [vmem:[#allocation5] sm:$0x3] %vm340_vm1, %v336_v55 }
 0x196   :  { %697 = vset.pattern.permute.xlu0 %v745_v57 }
 0x1b0   :  { %v359_v56 = vpop.trf.xlu0 }
 0x1b1   :  { %415 = vperm.xlu1 %696, %v359_v56  }
 0x1b4   :  { %v360_v58 = vpop.trf.xlu0 }
 0x1b5   :  { %420 = vperm.xlu1 %696, %v360_v58  }
 0x1b8   :  { %v361_v61 = vpop.trf.xlu0 }
 0x1b9   :  { %425 = vperm.xlu1 %696, %v361_v61  }
 0x1bc   :  { %v362_v1 = vpop.trf.xlu0 }
 0x1bd   :  { %430 = vperm.xlu1 %696, %v362_v1  }
 0x1c0   :  { %v363_v62 = vpop.trf.xlu0 }
 0x1c1   :  { %435 = vperm.xlu1 %696, %v363_v62  }
 0x1c4   :  { %v364_v63 = vpop.trf.xlu0 }
 0x1c5   :  { %440 = vperm.xlu1 %696, %v364_v63  }
 0x1c8   :  { %v365_v3 = vpop.trf.xlu0 }
 0x1c9   :  { %445 = vperm.xlu1 %696, %v365_v3  }
 0x1cc   :  { %v366_v8 = vpop.trf.xlu0 }
 0x1cd   :  { %450 = vperm.xlu1 %696, %v366_v8  }
 0x1d0   :  { %v367_v11 = vpop.trf.xlu0 }
 0x1d1   :  { %455 = vperm.xlu1 %696, %v367_v11  }
 0x1d4   :  { %v368_v12 = vpop.trf.xlu0 }
 0x1d5   :  { %460 = vperm.xlu0 %697, %v368_v12  }
 0x1d8   :  { %v369_v57 = vpop.trf.xlu0 }
 0x1dc   :  { %v370_v13 = vpop.trf.xlu0 }
 0x1e0   :  { %v371_v16 = vpop.trf.xlu0 }
 0x1e4   :  { %v372_v19 = vpop.trf.xlu0 }
 0x1e8   :  { %v373_v52 = vpop.trf.xlu0 }
 0x1ec   :  { %v374_v20 = vpop.trf.xlu0 }
 0x1f0   :  { %v391_v21 = vpop.trf.xlu0 }
 0x1f1   :  { %495 = vperm.xlu1 %696, %v391_v21  }
 0x1f4   :  { %v392_v26 = vpop.trf.xlu0 }
 0x1f5   :  { %500 = vperm.xlu1 %696, %v392_v26  }
 0x1f8   :  { %v393_v27 = vpop.trf.xlu0 }
 0x1f9   :  { %505 = vperm.xlu1 %696, %v393_v27  }
 0x1fc   :  { %v394_v28 = vpop.trf.xlu0 }
 0x1fd   :  { %510 = vperm.xlu1 %696, %v394_v28  }
 0x200   :  { %v395_v31 = vpop.trf.xlu0 }
 0x201   :  { %515 = vperm.xlu1 %696, %v395_v31  }
 0x204   :  { %v396_v34 = vpop.trf.xlu0 }
 0x205   :  { %520 = vperm.xlu1 %696, %v396_v34  }
 0x208   :  { %v397_v37 = vpop.trf.xlu0 }
 0x209   :  { %525 = vperm.xlu1 %696, %v397_v37  }
 0x20c   :  { %v398_v39 = vpop.trf.xlu0 }
 0x20d   :  { %530 = vperm.xlu1 %696, %v398_v39  }
 0x210   :  { %v399_v38 = vpop.trf.xlu0 }
 0x211   :  { %535 = vperm.xlu1 %696, %v399_v38  }
 0x214   :  { %v400_v44 = vpop.trf.xlu0 }
 0x215   :  { %540 = vperm.xlu1 %696, %v400_v44  }
 0x218   :  { %v401_v45 = vpop.trf.xlu0 }
 0x219   :  { %465 = vperm.xlu1 %696, %v369_v57  }
 0x21c   :  { %v402_v46 = vpop.trf.xlu0 }
 0x21d   :  { %545 = vperm.xlu1 %696, %v401_v45  }
 0x220   :  { %v403_v49 = vpop.trf.xlu0 }
 0x221   :  { %470 = vperm.xlu1 %696, %v370_v13  }
 0x224   :  { %v404_v56 = vpop.trf.xlu0 }
 0x225   :  { %550 = vperm.xlu1 %696, %v402_v46  }
 0x229   :  { %475 = vperm.xlu1 %696, %v371_v16  }
 0x22d   :  { %555 = vperm.xlu1 %696, %v403_v49  }
 0x230   :  { %v416_v51 = vpop.permute.xlu1 %415 }
 0x231   :  { %v573_v55 = vmul.f32 %v1079_v50, %v416_v51  ;;  %480 = vperm.xlu1 %696, %v372_v19  }
 0x233   :  { %v605_v58 = vadd.f32 %v573_v55, %v784_v0  ;;  %v405_v0 = vpop.trf.xlu0 }
 0x234   :  { %v421_v61 = vpop.permute.xlu1 %420 }
 0x235   :  { %637 = vst.msk [vmem:[%s1289_s4] sm:$0xff] %vm107_vm0, %v605_v58  ;;  %v574_v1 = vmul.f32 %v1079_v50, %v421_v61  ;;  %560 = vperm.xlu1 %696, %v404_v56  }
 0x237   :  { %v606_v62 = vadd.f32 %v574_v1, %v803_v5 }
 0x238   :  { %v426_v63 = vpop.permute.xlu1 %425 }
 0x239   :  { %638 = vst.msk [vmem:[%s1289_s4 + $0x8] sm:$0xff] %vm107_vm0, %v606_v62  ;;  %v575_v3 = vmul.f32 %v1079_v50, %v426_v63  ;;  %485 = vperm.xlu1 %696, %v373_v52  }
 0x23b   :  { %v607_v8 = vadd.f32 %v575_v3, %v794_v2  ;;  %v406_v2 = vpop.trf.xlu0 }
 0x23c   :  { %v431_v11 = vpop.permute.xlu1 %430 }
 0x23d   :  { %639 = vst.msk [vmem:[%s1289_s4 + $0x10] sm:$0xff] %vm107_vm0, %v607_v8  ;;  %v576_v5 = vmul.f32 %v1079_v50, %v431_v11  ;;  %565 = vperm.xlu1 %696, %v405_v0  }
 0x23f   :  { %v608_v12 = vadd.f32 %v576_v5, %v808_v6 }
 0x240   :  { %v436_v57 = vpop.permute.xlu1 %435 }
 0x241   :  { %640 = vst.msk [vmem:[%s1289_s4 + $0x18] sm:$0xff] %vm107_vm0, %v608_v12  ;;  %v577_v13 = vmul.f32 %v1079_v50, %v436_v57  ;;  %490 = vperm.xlu1 %696, %v374_v20  }
 0x243   :  { %v609_v16 = vadd.f32 %v577_v13, %v817_v9 }
 0x244   :  { %v441_v19 = vpop.permute.xlu1 %440 }
 0x245   :  { %641 = vst.msk [vmem:[%s1289_s4 + $0x20] sm:$0xff] %vm107_vm0, %v609_v16  ;;  %v578_v6 = vmul.f32 %v1079_v50, %v441_v19  ;;  %570 = vperm.xlu1 %696, %v406_v2  }
 0x247   :  { %v610_v52 = vadd.f32 %v578_v6, %v822_v10 }
 0x248   :  { %v446_v21 = vpop.permute.xlu1 %445 }
 0x249   :  { %642 = vst.msk [vmem:[%s1289_s4 + $0x28] sm:$0xff] %vm107_vm0, %v610_v52  ;;  %v579_v9 = vmul.f32 %v1079_v50, %v446_v21 }
 0x24a   :  { %729 = shalt.err (!%p726_p9)
}
 0x24b   :  { %s730_s26 = scalar_lea.hbm %s1290_s5, 32 }
 0x24c   :  { %p731_p10 = scmp.ne.s32.totalorder %s1290_s5, %s730_s26  ;;  %p734_p11 = scmp.lt.u32.totalorder %s730_s26, %s1290_s5 }
 0x24e   :  { %p736_p12 = pnand %p734_p11, %p731_p10 }
 0x250   :  { %739 = shalt.err (!%p736_p12)
}
 0x251   :  { %680 = dma.vmem_to_hbm [thread:$0]  %s678_s21, 32, %s1290_s5, [#allocation3]   ;;  %v611_v10 = vadd.f32 %v579_v9, %v835_v17  ;;  %v451_v20 = vpop.permute.xlu1 %450 }
 0x252   :  { %v580_v26 = vmul.f32 %v1079_v50, %v451_v20 }
 0x253   :  { %643 = vst.msk [vmem:[%s1289_s4 + $0x30] sm:$0xff] %vm107_vm0, %v611_v10 }
 0x254   :  { %v612_v27 = vadd.f32 %v580_v26, %v840_v18  ;;  %v461_v34 = vpop.permute.xlu0 %460 }
 0x255   :  { %v456_v28 = vpop.permute.xlu1 %455  ;;  %v582_v37 = vmul.f32 %v1079_v50, %v461_v34 }
 0x256   :  { %644 = vst.msk [vmem:[%s1289_s4 + $0x38] sm:$0xff] %vm107_vm0, %v612_v27  ;;  %v581_v31 = vmul.f32 %v1079_v50, %v456_v28 }
 0x257   :  { %v614_v18 = vadd.f32 %v582_v37, %v856_v24 }
 0x258   :  { %v613_v17 = vadd.f32 %v581_v31, %v851_v23 }
 0x259   :  { %646 = vst.msk [vmem:[%s1289_s4 + $0x48] sm:$0xff] %vm107_vm0, %v614_v18 }
 0x25a   :  { %645 = vst.msk [vmem:[%s1289_s4 + $0x40] sm:$0xff] %vm107_vm0, %v613_v17 }
 0x270   :  { %v496_v39 = vpop.permute.xlu1 %495 }
 0x271   :  { %v589_v38 = vmul.f32 %v1079_v50, %v496_v39 }
 0x273   :  { %v621_v23 = vadd.f32 %v589_v38, %v915_v47 }
 0x274   :  { %v501_v44 = vpop.permute.xlu1 %500 }
 0x275   :  { %653 = vst.msk [vmem:[%s1289_s4 + $0x80] sm:$0xff] %vm107_vm0, %v621_v23  ;;  %v590_v45 = vmul.f32 %v1079_v50, %v501_v44 }
 0x277   :  { %v622_v24 = vadd.f32 %v590_v45, %v920_v48 }
 0x278   :  { %v506_v46 = vpop.permute.xlu1 %505 }
 0x279   :  { %654 = vst.msk [vmem:[%s1289_s4 + $0x88] sm:$0xff] %vm107_vm0, %v622_v24  ;;  %v591_v49 = vmul.f32 %v1079_v50, %v506_v46 }
 0x27b   :  { %v623_v47 = vadd.f32 %v591_v49, %v931_v53 }
 0x27c   :  { %v511_v51 = vpop.permute.xlu1 %510 }
 0x27d   :  { %655 = vst.msk [vmem:[%s1289_s4 + $0x90] sm:$0xff] %vm107_vm0, %v623_v47  ;;  %v592_v55 = vmul.f32 %v1079_v50, %v511_v51 }
 0x27f   :  { %v624_v48 = vadd.f32 %v592_v55, %v936_v54 }
 0x280   :  { %v516_v56 = vpop.permute.xlu1 %515 }
 0x281   :  { %656 = vst.msk [vmem:[%s1289_s4 + $0x98] sm:$0xff] %vm107_vm0, %v624_v48  ;;  %v593_v58 = vmul.f32 %v1079_v50, %v516_v56 }
 0x283   :  { %v625_v53 = vadd.f32 %v593_v58, %v947_v59 }
 0x284   :  { %v521_v61 = vpop.permute.xlu1 %520 }
 0x285   :  { %657 = vst.msk [vmem:[%s1289_s4 + $0xa0] sm:$0xff] %vm107_vm0, %v625_v53  ;;  %v594_v1 = vmul.f32 %v1079_v50, %v521_v61 }
 0x287   :  { %v626_v54 = vadd.f32 %v594_v1, %v952_v60 }
 0x288   :  { %v526_v62 = vpop.permute.xlu1 %525 }
 0x289   :  { %658 = vst.msk [vmem:[%s1289_s4 + $0xa8] sm:$0xff] %vm107_vm0, %v626_v54  ;;  %v595_v63 = vmul.f32 %v1079_v50, %v526_v62 }
 0x28b   :  { %v627_v59 = vadd.f32 %v595_v63, %v963_v4 }
 0x28c   :  { %v531_v3 = vpop.permute.xlu1 %530 }
 0x28d   :  { %659 = vst.msk [vmem:[%s1289_s4 + $0xb0] sm:$0xff] %vm107_vm0, %v627_v59  ;;  %v596_v0 = vmul.f32 %v1079_v50, %v531_v3 }
 0x28f   :  { %v628_v60 = vadd.f32 %v596_v0, %v968_v7 }
 0x290   :  { %v536_v8 = vpop.permute.xlu1 %535 }
 0x291   :  { %660 = vst.msk [vmem:[%s1289_s4 + $0xb8] sm:$0xff] %vm107_vm0, %v628_v60  ;;  %v597_v11 = vmul.f32 %v1079_v50, %v536_v8 }
 0x293   :  { %v629_v4 = vadd.f32 %v597_v11, %v979_v14 }
 0x294   :  { %v541_v5 = vpop.permute.xlu1 %540 }
 0x295   :  { %661 = vst.msk [vmem:[%s1289_s4 + $0xc0] sm:$0xff] %vm107_vm0, %v629_v4  ;;  %v598_v12 = vmul.f32 %v1079_v50, %v541_v5 }
 0x297   :  { %v630_v7 = vadd.f32 %v598_v12, %v984_v15 }
 0x298   :  { %v466_v57 = vpop.permute.xlu1 %465 }
 0x299   :  { %662 = vst.msk [vmem:[%s1289_s4 + $0xc8] sm:$0xff] %vm107_vm0, %v630_v7  ;;  %v583_v13 = vmul.f32 %v1079_v50, %v466_v57 }
 0x29b   :  { %v615_v14 = vadd.f32 %v583_v13, %v867_v29 }
 0x29c   :  { %v546_v2 = vpop.permute.xlu1 %545 }
 0x29d   :  { %647 = vst.msk [vmem:[%s1289_s4 + $0x50] sm:$0xff] %vm107_vm0, %v615_v14  ;;  %v599_v16 = vmul.f32 %v1079_v50, %v546_v2 }
 0x29f   :  { %v631_v15 = vadd.f32 %v599_v16, %v995_v22 }
 0x2a0   :  { %v471_v19 = vpop.permute.xlu1 %470 }
 0x2a1   :  { %663 = vst.msk [vmem:[%s1289_s4 + $0xd0] sm:$0xff] %vm107_vm0, %v631_v15  ;;  %v584_v6 = vmul.f32 %v1079_v50, %v471_v19 }
 0x2a3   :  { %v616_v29 = vadd.f32 %v584_v6, %v872_v30 }
 0x2a4   :  { %v551_v52 = vpop.permute.xlu1 %550 }
 0x2a5   :  { %648 = vst.msk [vmem:[%s1289_s4 + $0x58] sm:$0xff] %vm107_vm0, %v616_v29  ;;  %v600_v21 = vmul.f32 %v1079_v50, %v551_v52 }
 0x2a7   :  { %v632_v22 = vadd.f32 %v600_v21, %v1000_v25 }
 0x2a8   :  { %v476_v9 = vpop.permute.xlu1 %475 }
 0x2a9   :  { %664 = vst.msk [vmem:[%s1289_s4 + $0xd8] sm:$0xff] %vm107_vm0, %v632_v22  ;;  %v585_v10 = vmul.f32 %v1079_v50, %v476_v9 }
 0x2ab   :  { %v617_v30 = vadd.f32 %v585_v10, %v883_v35 }
 0x2ac   :  { %v556_v20 = vpop.permute.xlu1 %555 }
 0x2ad   :  { %649 = vst.msk [vmem:[%s1289_s4 + $0x60] sm:$0xff] %vm107_vm0, %v617_v30  ;;  %v601_v26 = vmul.f32 %v1079_v50, %v556_v20 }
 0x2af   :  { %v633_v25 = vadd.f32 %v601_v26, %v1011_v32 }
 0x2b0   :  { %v481_v27 = vpop.permute.xlu1 %480 }
 0x2b1   :  { %665 = vst.msk [vmem:[%s1289_s4 + $0xe0] sm:$0xff] %vm107_vm0, %v633_v25  ;;  %v586_v28 = vmul.f32 %v1079_v50, %v481_v27 }
 0x2b3   :  { %v618_v35 = vadd.f32 %v586_v28, %v888_v36 }
 0x2b4   :  { %v561_v31 = vpop.permute.xlu1 %560 }
 0x2b5   :  { %650 = vst.msk [vmem:[%s1289_s4 + $0x68] sm:$0xff] %vm107_vm0, %v618_v35  ;;  %v602_v17 = vmul.f32 %v1079_v50, %v561_v31 }
 0x2b7   :  { %v634_v32 = vadd.f32 %v602_v17, %v1016_v33 }
 0x2b8   :  { %v486_v34 = vpop.permute.xlu1 %485 }
 0x2b9   :  { %666 = vst.msk [vmem:[%s1289_s4 + $0xe8] sm:$0xff] %vm107_vm0, %v634_v32  ;;  %v587_v37 = vmul.f32 %v1079_v50, %v486_v34 }
 0x2bb   :  { %v619_v36 = vadd.f32 %v587_v37, %v899_v41 }
 0x2bc   :  { %v566_v18 = vpop.permute.xlu1 %565 }
 0x2bd   :  { %651 = vst.msk [vmem:[%s1289_s4 + $0x70] sm:$0xff] %vm107_vm0, %v619_v36  ;;  %v603_v39 = vmul.f32 %v1079_v50, %v566_v18 }
 0x2bf   :  { %v635_v33 = vadd.f32 %v603_v39, %v1027_v40 }
 0x2c0   :  { %v491_v38 = vpop.permute.xlu1 %490 }
 0x2c1   :  { %667 = vst.msk [vmem:[%s1289_s4 + $0xf0] sm:$0xff] %vm107_vm0, %v635_v33  ;;  %v588_v23 = vmul.f32 %v1079_v50, %v491_v38 }
 0x2c3   :  { %v620_v41 = vadd.f32 %v588_v23, %v904_v42 }
 0x2c4   :  { %v571_v44 = vpop.permute.xlu1 %570 }
 0x2c5   :  { %652 = vst.msk [vmem:[%s1289_s4 + $0x78] sm:$0xff] %vm107_vm0, %v620_v41  ;;  %v604_v45 = vmul.f32 %v1079_v50, %v571_v44 }
 0x2c7   :  { %v636_v40 = vadd.f32 %v604_v45, %v1032_v43 }
 0x2c9   :  { %668 = vst.msk [vmem:[%s1289_s4 + $0xf8] sm:$0xff] %vm107_vm0, %v636_v40 }
 0x2ca   :  { %742 = dma.done.wait [#allocation3], 32  }
 0x2cb   :  { %743 = vsyncadd [#allocation3], 4294967264 }
 0x2cc   :  { %686 = vsyncpa [#allocation3], 1 }
 0x2cd   :  { %687 = vsyncpa [#allocation4], 1 }

</bundles_post_ra>
